<compile_context>
chip_gen: v6e
topology: v6e:2x2x1
jax: 0.10.0
libtpu: 0.0.40
codegen_flags: <defaults>
</compile_context>

<pallas_src>
import functools

import jax
import jax.numpy as jnp
from jax.experimental import pallas as pl
from jax.experimental.pallas import tpu as pltpu


def _dice_partial_kernel(p_ref, t_ref, num_ref, den_ref, *,
                         p_exp, lanes, sub_rows, sub_steps, rem_rows):
    """One grid step: accumulate per-sample dice partial sums.

    p_ref / t_ref : (tile_r, lanes) dense block of one sample's features.
    num_ref / den_ref : (8, lanes) f32 resident accumulator for that sample.
    """
    k = pl.program_id(1)

    @pl.when(k == 0)
    def _init():
        num_ref[...] = jnp.zeros_like(num_ref)
        den_ref[...] = jnp.zeros_like(den_ref)

    def chunk_sums(pred_raw, targ_raw):
        pred = pred_raw.astype(jnp.float32)
        targ = targ_raw.astype(jnp.float32)
        num_c = pred * targ
        if p_exp == 2:
            den_c = pred * pred + targ * targ
        elif p_exp == 1:
            den_c = pred + targ
        else:
            den_c = jnp.power(pred, float(p_exp)) + jnp.power(targ, float(p_exp))
        rows = pred.shape[0]
        # Fold rows into the (8, lanes) accumulator: the reshape splits the
        # sublane axis exactly on (8,128) vreg tile boundaries, so the sum is
        # pure elementwise VPU adds (no XLU traffic in the hot loop).
        return (num_c.reshape(rows // 8, 8, lanes).sum(axis=0),
                den_c.reshape(rows // 8, 8, lanes).sum(axis=0))

    num_v = jnp.zeros((8, lanes), jnp.float32)
    den_v = jnp.zeros((8, lanes), jnp.float32)

    if sub_steps > 0:
        def body(i, carry):
            nv, dv = carry
            r0 = pl.multiple_of(i * sub_rows, sub_rows)
            nc, dc = chunk_sums(p_ref[pl.ds(r0, sub_rows), :],
                                t_ref[pl.ds(r0, sub_rows), :])
            return nv + nc, dv + dc
        num_v, den_v = jax.lax.fori_loop(0, sub_steps, body, (num_v, den_v))

    if rem_rows > 0:   # static remainder chunk (also the whole-block fast path)
        r0 = sub_steps * sub_rows
        nc, dc = chunk_sums(p_ref[pl.ds(r0, rem_rows), :],
                            t_ref[pl.ds(r0, rem_rows), :])
        num_v = num_v + nc
        den_v = den_v + dc

    num_ref[...] += num_v
    den_ref[...] += den_v


def _plan(d, itemsize_max, row_align, max_step_rows=None):
    """Pick (lanes, tile_r, k_steps, rows_per_sample) for the row layout."""
    lanes = 128
    rows = -(-d // lanes)                       # 128-lane rows per sample
    rows = -(-rows // row_align) * row_align    # pad to dense sublane tiles
    # Per-grid-step payload target (both operands) and VMEM budget for the two
    # double-buffered input blocks.  In-kernel intermediates are bounded by the
    # sub-chunk size, so they do not scale with tile_r.
    target_step_bytes = 8 * 1024 * 1024
    vmem_budget_bytes = 20 * 1024 * 1024        # safe on v5e/v6e (128 MiB) & v7x (64 MiB)
    per_row_bytes = 2 * lanes * itemsize_max
    max_rows = min(target_step_bytes // per_row_bytes,
                   vmem_budget_bytes // (2 * per_row_bytes))
    if max_step_rows is not None:
        max_rows = min(max_rows, max_step_rows)
    max_rows = max(row_align, max_rows // row_align * row_align)
    if rows <= max_rows:
        return lanes, rows, 1, rows
    k_steps = -(-rows // max_rows)
    per_step = -(-rows // k_steps)              # balance work across steps
    tile_r = -(-per_step // row_align) * row_align
    return lanes, tile_r, k_steps, k_steps * tile_r


def binary_dice_loss(predict, target, smooth=1, p=2, reduction="mean",
                     *, _max_step_rows=None, _sub_rows=256):
    assert predict.shape[0] == target.shape[0], "predict & target batch size don't match"
    n = predict.shape[0]
    pred2d = predict.reshape(n, -1)
    targ2d = target.reshape(n, -1)
    d = pred2d.shape[1]

    p_item = jnp.dtype(pred2d.dtype).itemsize
    t_item = jnp.dtype(targ2d.dtype).itemsize
    # Row alignment so sub-full blocks stay on native sublane-packing tiles
    # (f32 -> 8, bf16 -> 16, int8 -> 32 rows).
    row_align = 8 * max(1, 4 // min(p_item, t_item))
    lanes, tile_r, k_steps, rows = _plan(d, max(p_item, t_item), row_align,
                                         _max_step_rows)

    d_pad = rows * lanes
    if d_pad != d:
        if not p > 0:
            raise ValueError("zero-padding the feature axis requires p > 0")
        pred2d = jnp.pad(pred2d, ((0, 0), (0, d_pad - d)))
        targ2d = jnp.pad(targ2d, ((0, 0), (0, d_pad - d)))
    # Row-major contiguous reshape (free): sample s owns rows [s*rows, (s+1)*rows).
    pred_rows = pred2d.reshape(n * rows, lanes)
    targ_rows = targ2d.reshape(n * rows, lanes)

    # In-kernel streaming sub-chunks (bounds VMEM intermediates / vreg pressure).
    sub_rows = max(8, min(_sub_rows, tile_r) // 8 * 8)
    sub_steps, rem_rows = divmod(tile_r, sub_rows)
    if sub_steps == 1 and rem_rows == 0:        # small blocks: straight-line body
        sub_steps, rem_rows = 0, tile_r

    kernel = functools.partial(_dice_partial_kernel, p_exp=p, lanes=lanes,
                               sub_rows=sub_rows, sub_steps=sub_steps,
                               rem_rows=rem_rows)

    cost = pl.CostEstimate(
        flops=(6 if p == 2 else 4) * n * d_pad,
        transcendentals=0 if p in (1, 2) else 2 * n * d_pad,
        bytes_accessed=(p_item + t_item) * n * d_pad + 2 * n * 8 * lanes * 4,
    )

    num_p, den_p = pl.pallas_call(
        kernel,
        out_shape=(jax.ShapeDtypeStruct((n * 8, lanes), jnp.float32),
                   jax.ShapeDtypeStruct((n * 8, lanes), jnp.float32)),
        grid_spec=pltpu.PrefetchScalarGridSpec(
            num_scalar_prefetch=0,
            grid=(n, k_steps),   # samples (parallel), reduction steps (arbitrary, last)
            in_specs=[
                pl.BlockSpec((tile_r, lanes), lambda s, k, _ks=k_steps: (s * _ks + k, 0)),
                pl.BlockSpec((tile_r, lanes), lambda s, k, _ks=k_steps: (s * _ks + k, 0)),
            ],
            out_specs=[
                pl.BlockSpec((8, lanes), lambda s, k: (s, 0)),
                pl.BlockSpec((8, lanes), lambda s, k: (s, 0)),
            ],
        ),
        compiler_params=pltpu.CompilerParams(
            dimension_semantics=("parallel", "arbitrary"),
            vmem_limit_bytes=32 * 1024 * 1024,
        ),
        cost_estimate=cost,
    )(pred_rows, targ_rows)

    # Tiny JAX epilogue: one cross-lane reduce per sample, smooth, dice, reduce.
    num = num_p.reshape(n, 8 * lanes).sum(axis=1) + smooth
    den = den_p.reshape(n, 8 * lanes).sum(axis=1) + smooth
    loss = 1.0 - num / den
    if reduction == "mean":
        return loss.mean()
    elif reduction == "sum":
        return loss.sum()
    elif reduction == "none":
        return loss
    else:
        raise Exception("Unexpected reduction {}".format(reduction))


def _reference(predict, target, smooth=1, p=2, reduction="mean"):
    n = predict.shape[0]
    pred = predict.reshape(n, -1).astype(jnp.float32)
    targ = target.reshape(n, -1).astype(jnp.float32)
    num = jnp.sum(pred * targ, axis=1) + smooth
    den = jnp.sum(pred ** p + targ ** p, axis=1) + smooth
    loss = 1.0 - num / den
    if reduction == "mean":
        return loss.mean()
    if reduction == "sum":
        return loss.sum()
    return loss


if __name__ == "__main__":
    key = jax.random.PRNGKey(0)
    k1, k2, k3, k4, k5, k6 = jax.random.split(key, 6)

    def check(out, ref):
        out = jax.block_until_ready(out)
        assert jnp.allclose(out, ref, rtol=1e-5, atol=1e-6), (out, ref)

    # Case 1: canonical NCHW sigmoid probs vs binary mask, D = 4*16*16 = 1024
    # -> one dense (8,128) block per sample, grid (2, 1).
    shape1 = (2, 4, 16, 16)
    pred1 = jax.nn.sigmoid(jax.random.normal(k1, shape1, dtype=jnp.float32))
    targ1 = (jax.random.uniform(k2, shape1) > 0.5).astype(jnp.float32)
    check(binary_dice_loss(pred1, targ1), _reference(pred1, targ1))

    # Case 2: D = 4*48*48 = 9216 -> (72,128) rows per sample, 'sum' reduction.
    shape2 = (2, 4, 48, 48)
    pred2 = jax.nn.sigmoid(jax.random.normal(k3, shape2, dtype=jnp.float32))
    targ2 = (jax.random.uniform(k4, shape2) > 0.5).astype(jnp.float32)
    check(binary_dice_loss(pred2, targ2, reduction="sum"),
          _reference(pred2, targ2, reduction="sum"))

    # Case 3a: force a multi-step reduction grid (k_steps=3, output-resident acc).
    check(binary_dice_loss(pred2, targ2, _max_step_rows=32),
          _reference(pred2, targ2))
    # Case 3b: force the in-kernel fori_loop + remainder-chunk paths.
    check(binary_dice_loss(pred2, targ2, _sub_rows=16),
          _reference(pred2, targ2))

    # Case 4: ragged D (=300) exercising the zero-pad path; p=1, 'none' reduction.
    shape4 = (2, 3, 10, 10)
    pred4 = jax.nn.sigmoid(jax.random.normal(k5, shape4, dtype=jnp.float32))
    targ4 = (jax.random.uniform(k6, shape4) > 0.5).astype(jnp.float32)
    check(binary_dice_loss(pred4, targ4, p=1, reduction="none"),
          _reference(pred4, targ4, p=1, reduction="none"))

    # Case 5: bf16 predictions (half the HBM read traffic); kernel casts to f32.
    check(binary_dice_loss(pred2.astype(jnp.bfloat16), targ2),
          _reference(pred2.astype(jnp.bfloat16), targ2))

    print("KERNEL_OK")
</pallas_src>

<mosaic_0001>
module attributes {stable_mosaic.version = 11 : i64} {
  func.func @_dice_partial_kernel(%arg0: i32, %arg1: i32, %arg2: memref<8x128xf32, #tpu.memory_space<vmem>>, %arg3: memref<8x128xf32, #tpu.memory_space<vmem>>, %arg4: memref<8x128xf32, #tpu.memory_space<vmem>>, %arg5: memref<8x128xf32, #tpu.memory_space<vmem>>) attributes {dimension_semantics = [#tpu.dimension_semantics<parallel>, #tpu.dimension_semantics<arbitrary>], iteration_bounds = array<i64: 2, 1>, scalar_prefetch = 0 : i64, scratch_operands = 0 : i64, tpu.core_type = #tpu.core_type<tc>, window_params = [{transform_indices = @transform_0, window_bounds = array<i64: 8, 128>}, {transform_indices = @transform_1, window_bounds = array<i64: 8, 128>}, {transform_indices = @transform_2, window_bounds = array<i64: 8, 128>}, {transform_indices = @transform_3, window_bounds = array<i64: 8, 128>}]} {
    %c0_i32 = arith.constant 0 : i32
    %0 = arith.cmpi eq, %arg1, %c0_i32 : i32
    %1 = arith.extui %0 : i1 to i32
    %c0_i32_0 = arith.constant 0 : i32
    %2 = arith.cmpi ne, %1, %c0_i32_0 : i32
    scf.if %2 {
      %cst_15 = arith.constant 0.000000e+00 : f32
      %23 = vector.broadcast %cst_15 : f32 to vector<8x128xf32>
      %c0_16 = arith.constant 0 : index
      %c0_17 = arith.constant 0 : index
      %24 = vector.load %arg4[%c0_16, %c0_17] : memref<8x128xf32, #tpu.memory_space<vmem>>, vector<8x128xf32>
      tpu.vector_store %arg4[%c0_16, %c0_17], %23 {strides = array<i32>} : memref<8x128xf32, #tpu.memory_space<vmem>>, vector<8x128xf32>,
      %cst_18 = arith.constant 0.000000e+00 : f32
      %25 = vector.broadcast %cst_18 : f32 to vector<8x128xf32>
      %c0_19 = arith.constant 0 : index
      %c0_20 = arith.constant 0 : index
      %26 = vector.load %arg5[%c0_19, %c0_20] : memref<8x128xf32, #tpu.memory_space<vmem>>, vector<8x128xf32>
      tpu.vector_store %arg5[%c0_19, %c0_20], %25 {strides = array<i32>} : memref<8x128xf32, #tpu.memory_space<vmem>>, vector<8x128xf32>,
    } else {
    }
    %cst = arith.constant 0.000000e+00 : f32
    %3 = vector.broadcast %cst : f32 to vector<8x128xf32>
    %cst_1 = arith.constant 0.000000e+00 : f32
    %4 = vector.broadcast %cst_1 : f32 to vector<8x128xf32>
    %c0 = arith.constant 0 : index
    %c0_2 = arith.constant 0 : index
    %5 = vector.load %arg2[%c0, %c0_2] : memref<8x128xf32, #tpu.memory_space<vmem>>, vector<8x128xf32>
    %c0_3 = arith.constant 0 : index
    %c0_4 = arith.constant 0 : index
    %6 = vector.load %arg3[%c0_3, %c0_4] : memref<8x128xf32, #tpu.memory_space<vmem>>, vector<8x128xf32>
    %7 = arith.mulf %5, %6 : vector<8x128xf32>
    %8 = arith.mulf %5, %5 : vector<8x128xf32>
    %9 = arith.mulf %6, %6 : vector<8x128xf32>
    %10 = arith.addf %8, %9 : vector<8x128xf32>
    %11 = vector.shape_cast %7 : vector<8x128xf32> to vector<1x8x128xf32>
    %cst_5 = arith.constant dense<0.000000e+00> : vector<8x128xf32>
    %12 = vector.multi_reduction <add>, %11, %cst_5 [0] : vector<1x8x128xf32> to vector<8x128xf32>
    %13 = vector.shape_cast %10 : vector<8x128xf32> to vector<1x8x128xf32>
    %cst_6 = arith.constant dense<0.000000e+00> : vector<8x128xf32>
    %14 = vector.multi_reduction <add>, %13, %cst_6 [0] : vector<1x8x128xf32> to vector<8x128xf32>
    %15 = arith.addf %3, %12 : vector<8x128xf32>
    %16 = arith.addf %4, %14 : vector<8x128xf32>
    %c0_7 = arith.constant 0 : index
    %c0_8 = arith.constant 0 : index
    %17 = vector.load %arg4[%c0_7, %c0_8] : memref<8x128xf32, #tpu.memory_space<vmem>>, vector<8x128xf32>
    %18 = arith.addf %17, %15 : vector<8x128xf32>
    %c0_9 = arith.constant 0 : index
    %c0_10 = arith.constant 0 : index
    %19 = vector.load %arg4[%c0_9, %c0_10] : memref<8x128xf32, #tpu.memory_space<vmem>>, vector<8x128xf32>
    tpu.vector_store %arg4[%c0_9, %c0_10], %18 {strides = array<i32>} : memref<8x128xf32, #tpu.memory_space<vmem>>, vector<8x128xf32>,
    %c0_11 = arith.constant 0 : index
    %c0_12 = arith.constant 0 : index
    %20 = vector.load %arg5[%c0_11, %c0_12] : memref<8x128xf32, #tpu.memory_space<vmem>>, vector<8x128xf32>
    %21 = arith.addf %20, %16 : vector<8x128xf32>
    %c0_13 = arith.constant 0 : index
    %c0_14 = arith.constant 0 : index
    %22 = vector.load %arg5[%c0_13, %c0_14] : memref<8x128xf32, #tpu.memory_space<vmem>>, vector<8x128xf32>
    tpu.vector_store %arg5[%c0_13, %c0_14], %21 {strides = array<i32>} : memref<8x128xf32, #tpu.memory_space<vmem>>, vector<8x128xf32>,
    return
  }
  func.func @transform_0(%arg0: i32, %arg1: i32) -> (i32, i32) {
    %c1_i32 = arith.constant 1 : i32
    %0 = arith.muli %arg0, %c1_i32 : i32
    %1 = arith.addi %0, %arg1 : i32
    %c0_i32 = arith.constant 0 : i32
    %c0_i32_0 = arith.constant 0 : i32
    return %1, %c0_i32 : i32, i32
  }
  func.func @transform_1(%arg0: i32, %arg1: i32) -> (i32, i32) {
    %c1_i32 = arith.constant 1 : i32
    %0 = arith.muli %arg0, %c1_i32 : i32
    %1 = arith.addi %0, %arg1 : i32
    %c0_i32 = arith.constant 0 : i32
    %c0_i32_0 = arith.constant 0 : i32
    return %1, %c0_i32 : i32, i32
  }
  func.func @transform_2(%arg0: i32, %arg1: i32) -> (i32, i32) {
    %c0_i32 = arith.constant 0 : i32
    %c0_i32_0 = arith.constant 0 : i32
    return %arg0, %c0_i32 : i32, i32
  }
  func.func @transform_3(%arg0: i32, %arg1: i32) -> (i32, i32) {
    %c0_i32 = arith.constant 0 : i32
    %c0_i32_0 = arith.constant 0 : i32
    return %arg0, %c0_i32 : i32, i32
  }
}

</mosaic_0001>

<bundles_post_ra>
// kernel: tpu_custom_call.1
= control target key start
LH: loop header
LB: loop body
LE: loop exit
PB: predicated region body
PF: predicated region fallthrough
CT: control target
= control target key end

     0   :  { %9 = vsyncpa [#allocation3], 0  ;;  %s942_s0 = inlined_call_operand.hbm [shape: f32[16,128], index: 0, kind: input, shape index: {}]   ;;  %s943_s1 = inlined_call_operand.hbm [shape: f32[16,128], index: 1, kind: input, shape index: {}]   ;;  %s944_s2 = inlined_call_operand.hbm [shape: f32[16,128], index: 2, kind: output, shape index: {0}]   ;;  %s945_s3 = inlined_call_operand.hbm [shape: f32[16,128], index: 3, kind: output, shape index: {1}]  }
   0x1   :  { %11 = vsyncpa [#allocation3 + $0x1], 0 }
   0x2   :  { %12 = vsyncpa [#allocation6], 0 }
   0x3   :  { %14 = vsyncpa [#allocation6 + $0x1], 0 }
   0x4   :  { %15 = vsyncpa [#allocation4], 0 }
   0x5   :  { %17 = vsyncpa [#allocation4 + $0x1], 0 }
   0x6   :  { %18 = vsyncpa [#allocation9], 0 }
   0x7   :  { %20 = vsyncpa [#allocation9 + $0x1], 0  ;;  %s731_s12 = smov 0   ;;  %s733_s13 = smov 0  }
   0x8   :  { %s735_s14 = smov 0   ;;  %s737_s15 = smov 0  }
   0x9   :  { %s739_s16 = smov 0   ;;  %s741_s17 = smov 0  }
   0xa LB: > { %s443_s18 = sadd.s32 4294967295, %s705_s17   ;;  %s444_s19 = sadd.s32 4294967294, %s705_s17   ;;  %s705_s17 = sphi %s741_s17, %s26_s17   ;;  %s701_s16 = sphi %s739_s16, %s957_s16   ;;  %s697_s15 = sphi %s737_s15, %s956_s15   ;;  %s693_s14 = sphi %s735_s14, %s955_s14   ;;  %s689_s13 = sphi %s733_s13, %s954_s13   ;;  %s685_s12 = sphi %s731_s12, %s953_s12  }
   0xb   : > { %s38_s20 = sadd.s32 1, %s701_s16  ;;  %s47_s21 = sadd.s32 1, %s693_s14 }
   0xc   : > { %p40_p0 = scmp.ge.s32.totalorder %s38_s20, 2  ;;  %p54_p1 = scmp.ne.s32.totalorder %s693_s14, %s689_s13 }
   0xd   : > { %p55_p2 = scmp.eq.s32.totalorder %s705_s17, 0  ;;  %p60_p3 = scmp.ne.s32.totalorder %s689_s13, %s685_s12 }
   0xe   : > { %s959_s20 = smov (%p40_p0, %s38_s20), 0  ;;  %p61_p5 = scmp.eq.s32.totalorder %s443_s18, 0 }
   0xf   : > { %p772_p4 = por %p55_p2, %p54_p1  ;;  %s44_s23 = ssub.s32 %s701_s16, %s959_s20 }
  0x10   : > { %p112_p6 = scmp.eq.s32.totalorder %s443_s18, 1  ;;  %p45_p7 = scmp.eq.s32.totalorder %s44_s23, 0 }
  0x11   : > { %p778_p8 = por %p61_p5, %p60_p3  ;;  %p118_p10 = scmp.eq.s32.totalorder %s444_s19, 1 }
  0x12   : > { %p782_p9 = por %p112_p6, %p54_p1  ;;  %p484_p13 = scmp.lt.s32.totalorder %s705_s17, 2 }
  0x13   : > { %s787_s26 = scalar_select %p45_p7, %s693_s14, %s47_s21  }
  0x14   : > { %p789_p11 = por %p118_p10, %p60_p3  ;;  %s796_s28 = sand.u32 1, %s693_s14  }
  0x15   : > { %s447_s29 = sshll.u32 %s796_s28, 3  ;;  %s448_s30 = sshll.u32 %s701_s16, 7 }
  0x16   : > { %s174_s6 = scalar_lea.hbm %s942_s0, %s448_s30  ;;  %s168_s7 = scalar_lea.vmem [#allocation2], %s447_s29 }
  0x17   : > { %s176_s8 = sshll.u32 %s168_s7, 4  ;;  %p805_p0 = pnand %p484_p13, %p772_p4  ;;  %s177_s8 = int_to_ptr.vmem [resolvable:$true] %s176_s8 }
  0x18   : > { %p451_p1 = scmp.ge.s32.totalorder %s705_s17, 1  ;;  %p200_p2 = scmp.lt.s32.totalorder %s705_s17, 3 }
  0x19   : > { %s165_s10 = scalar_lea.sflag [#allocation3], %s796_s28  ;;  %p537_p3 = pneg %p805_p0 }
  0x1a   : > { %s548_s11 = scalar_lea.vmem %s177_s8, 128  ;;  %s707_s18 = smov [#allocation2]  }
  0x1b   : > { %p549_p5 = scmp.ne.s32.totalorder %s177_s8, %s548_s11  ;;  %s553_s19 = sshll.u32 %s707_s18, 4  ;;  %s554_s19 = int_to_ptr.vmem [resolvable:$false] %s553_s19 }
  0x1c   : > { %s555_s21 = scalar_lea.vmem %s554_s19, 256  ;;  %p556_p4 = scmp.lt.s32.totalorder %s177_s8, %s554_s19 }
  0x1d   : > { %p551_p6 = pnand %p549_p5, %p537_p3  ;;  %p557_p10 = scmp.lt.s32.totalorder %s555_s21, %s548_s11 }
  0x1f   : > { %p552_p7 = pneg %p551_p6  ;;  %p558_p13 = por %p557_p10, %p556_p4 }
  0x21   : > { %p559_p12 = pnand %p558_p13, %p552_p7 }
  0x23   : > { %562 = shalt.err (!%p559_p12)
}
  0x24   : > { %473 = dma.hbm_to_vmem [thread:$0]  (!%p805_p0), %s174_s6, 128, %s177_s8, %s165_s10  }
  0x25   : > { %p823_p5 = pnand %p451_p1, %p200_p2  ;;  %s193_s5 = scalar_lea.hbm %s943_s1, %s448_s30 }
  0x26   : > { %s187_s7 = scalar_lea.vmem [#allocation5], %s447_s29  ;;  %s184_s18 = scalar_lea.sflag [#allocation6], %s796_s28 }
  0x27   : > { %s195_s11 = sshll.u32 %s187_s7, 4  ;;  %s708_s6 = smov [#allocation5]   ;;  %s196_s11 = int_to_ptr.vmem [resolvable:$true] %s195_s11 }
  0x28   : > { %s576_s19 = scalar_lea.vmem %s196_s11, 128  ;;  %s581_s8 = sshll.u32 %s708_s6, 4  ;;  %s582_s8 = int_to_ptr.vmem [resolvable:$false] %s581_s8 }
  0x29   : > { %p577_p12 = scmp.ne.s32.totalorder %s196_s11, %s576_s19  ;;  %s583_s10 = scalar_lea.vmem %s582_s8, 256 }
  0x2a   : > { %p584_p1 = scmp.lt.s32.totalorder %s196_s11, %s582_s8  ;;  %p585_p2 = scmp.lt.s32.totalorder %s583_s10, %s576_s19 }
  0x2b   : > { %p579_p6 = pnand %p577_p12, %p537_p3 }
  0x2c   : > { %p586_p4 = por %p585_p2, %p584_p1 }
  0x2d   : > { %p580_p7 = pneg %p579_p6 }
  0x2f   : > { %p587_p10 = pnand %p586_p4, %p580_p7 }
  0x31   : > { %590 = shalt.err (!%p587_p10)
}
  0x32   : > { %476 = dma.hbm_to_vmem [thread:$0]  (!%p805_p0), %s193_s5, 128, %s196_s11, %s184_s18  }
  0x33   : > { %204 = sbr.rel (%p823_p5) target bundleno = 106 (0x6a), region = 28  ;;  %s839_s28 = sand.u32 (!%p823_p5), 1, %s689_s13  }
  0x34   : > { %s842_s29 = sshll.u32 (!%p823_p5), %s839_s28, 3  ;;  %s207_s30 = scalar_lea.sflag (!%p823_p5), [#allocation3], %s839_s28 }
  0x35   : > { %s210_s21 = scalar_lea.vmem (!%p823_p5), [#allocation2], %s842_s29 }
  0x38   : > { %668 = dma.done.wait (%p778_p8), %s207_s30, 128  }
  0x39   : > { %670 = vsyncadd (%p778_p8), %s207_s30, 4294967168  ;;  %s216_s9 = scalar_lea.sflag [#allocation6], %s839_s28  ;;  %s219_s22 = scalar_lea.vmem [#allocation5], %s842_s29 }
  0x3a   : > { %672 = dma.done.wait (%p778_p8), %s216_s9, 128  }
  0x3b   : > { %674 = vsyncadd (%p778_p8), %s216_s9, 4294967168  ;;  %v260_v0 = vld [vmem:[%s210_s21] sm:$0xff]  ;;  %v261_v1 = vld [vmem:[%s219_s22] sm:$0xff]  ;;  %s458_s23 = sshll.u32 %s697_s15, 7  ;;  %s244_s4 = scalar_lea.vmem [#allocation7], %s842_s29 }
  0x3c   : > { %s295_s5 = sshll.u32 %s244_s4, 4  ;;  %v262_v2 = vmul.f32 %v261_v1, %v260_v0  ;;  %v263_v3 = vmul.f32 %v260_v0, %v260_v0  ;;  %v264_v4 = vmul.f32 %v261_v1, %v261_v1  ;;  %s251_s7 = scalar_lea.vmem [#allocation8], %s842_s29  ;;  %s866_s5 = int_to_ptr.vmem [resolvable:$true] %s295_s5 }
  0x3d   : > { %s308_s11 = sshll.u32 %s251_s7, 4  ;;  %s864_s19 = scalar_lea.hbm %s944_s2, %s458_s23  ;;  %s873_s11 = int_to_ptr.vmem [resolvable:$true] %s308_s11 }
  0x3e   : > { %v265_v5 = vadd.f32 %v264_v4, %v263_v3  ;;  %272 = vst [vmem:[%s244_s4] sm:$0xff] %v262_v2  ;;  %s871_s8 = scalar_lea.hbm %s945_s3, %s458_s23  ;;  %s277_s10 = scalar_lea.sflag [#allocation4], %s839_s28 }
  0x3f   : > { %s591_s30 = scalar_lea.vmem %s866_s5, 128  ;;  %s709_s21 = smov [#allocation7]  }
  0x40   : > { %p592_p8 = scmp.ne.s32.totalorder %s866_s5, %s591_s30  ;;  %s595_s9 = sshll.u32 %s709_s21, 4  ;;  %s596_s9 = int_to_ptr.vmem [resolvable:$false] %s595_s9 }
  0x41   : > { %s597_s22 = scalar_lea.vmem %s596_s9, 256  ;;  %p598_p13 = scmp.lt.s32.totalorder %s866_s5, %s596_s9 }
  0x42   : > { %p593_p0 = pnand %p592_p8, %p782_p9  ;;  %p599_p5 = scmp.lt.s32.totalorder %s597_s22, %s591_s30 }
  0x44   : > { %p594_p3 = pneg %p593_p0  ;;  %p600_p12 = por %p599_p5, %p598_p13 }
  0x46   : > { %p601_p6 = pnand %p600_p12, %p594_p3 }
  0x48   : > { %604 = shalt.err (!%p601_p6)
}
  0x49   : > { %s605_s23 = scalar_lea.hbm %s864_s19, 128  ;;  %s609_s18 = scalar_lea.hbm %s944_s2, 256 }
  0x4a   : > { %p606_p7 = scmp.ne.s32.totalorder %s864_s19, %s605_s23  ;;  %p610_p4 = scmp.lt.s32.totalorder %s864_s19, %s944_s2 }
  0x4b   : > { %p611_p10 = scmp.lt.s32.totalorder %s609_s18, %s605_s23 }
  0x4c   : > { %p607_p1 = pnand %p606_p7, %p782_p9 }
  0x4d   : > { %p612_p8 = por %p611_p10, %p610_p4 }
  0x4e   : > { %p608_p2 = pneg %p607_p1 }
  0x50   : > { %p613_p0 = pnand %p612_p8, %p608_p2 }
  0x52   : > { %616 = shalt.err (!%p613_p0)
}
  0x53   : > { %466 = dma.vmem_to_hbm [thread:$0]  (%p782_p9), %s866_s5, 128, %s864_s19, %s277_s10   ;;  %275 = vst [vmem:[%s251_s7] sm:$0xff] %v265_v5 }
  0x54   : > { %s282_s30 = scalar_lea.sflag [#allocation9], %s839_s28  ;;  %s617_s21 = scalar_lea.vmem %s873_s11, 128 }
  0x55   : > { %p618_p3 = scmp.ne.s32.totalorder %s873_s11, %s617_s21  ;;  %s710_s9 = smov [#allocation8]  }
  0x56   : > { %s621_s22 = sshll.u32 %s710_s9, 4  ;;  %s622_s22 = int_to_ptr.vmem [resolvable:$false] %s621_s22 }
  0x57   : > { %p619_p13 = pnand %p618_p3, %p782_p9  ;;  %s623_s23 = scalar_lea.vmem %s622_s22, 256 }
  0x58   : > { %p624_p12 = scmp.lt.s32.totalorder %s873_s11, %s622_s22  ;;  %p625_p6 = scmp.lt.s32.totalorder %s623_s23, %s617_s21 }
  0x59   : > { %p620_p5 = pneg %p619_p13 }
  0x5a   : > { %p626_p7 = por %p625_p6, %p624_p12 }
  0x5c   : > { %p627_p1 = pnand %p626_p7, %p620_p5 }
  0x5e   : > { %630 = shalt.err (!%p627_p1)
}
  0x5f   : > { %s631_s29 = scalar_lea.hbm %s871_s8, 128  ;;  %s635_s7 = scalar_lea.hbm %s945_s3, 256 }
  0x60   : > { %p632_p2 = scmp.ne.s32.totalorder %s871_s8, %s631_s29  ;;  %p636_p8 = scmp.lt.s32.totalorder %s871_s8, %s945_s3 }
  0x61   : > { %p637_p0 = scmp.lt.s32.totalorder %s635_s7, %s631_s29 }
  0x62   : > { %p633_p4 = pnand %p632_p2, %p782_p9 }
  0x63   : > { %p638_p3 = por %p637_p0, %p636_p8 }
  0x64   : > { %p634_p10 = pneg %p633_p4 }
  0x66   : > { %p639_p13 = pnand %p638_p3, %p634_p10 }
  0x68   : > { %642 = shalt.err (!%p639_p13)
}
  0x69   : > { %467 = dma.vmem_to_hbm [thread:$0]  (%p782_p9), %s873_s11, 128, %s871_s8, %s282_s30  }
  0x6a PF: > { %s320_s4 = sand.u32 1, %s685_s12   ;;  %p952_p5 = scmp.ge.s32.totalorder %s705_s17, 2 }
  0x6b   : > { %s321_s24 = scalar_lea.sflag [#allocation4], %s320_s4 }
  0x6c   : > { %p478_p12 = pnand %p952_p5, %p789_p11 }
  0x6e   : > { %p479_p6 = pneg %p478_p12 }
  0x70   : > { %676 = dma.done.wait (%p479_p6), %s321_s24, 128  }
  0x71   : > { %678 = vsyncadd (%p479_p6), %s321_s24, 4294967168  ;;  %s330_s18 = scalar_lea.sflag [#allocation9], %s320_s4 }
  0x72   : > { %680 = dma.done.wait (%p479_p6), %s330_s18, 128  }
  0x73   : > { %682 = vsyncadd (%p479_p6), %s330_s18, 4294967168  ;;  %s26_s17 = sadd.s32 1, %s705_s17   ;;  %s953_s12 = smov %s689_s13 }
  0x74   : > { %p23_p7 = scmp.ge.s32.totalorder %s26_s17, 4   ;;  %s954_s13 = smov %s693_s14 }
  0x75   : > { %s955_s14 = smov %s787_s26  ;;  %s956_s15 = smov %s701_s16 }
  0x76   : > { %s957_s16 = smov %s959_s20  ;;  %25 = sbr.rel (!%p23_p7) target bundleno = 10 (0xa), region = 107 }
  0x7b   :  { %335 = vsyncpa [#allocation3], 1 }
  0x7c   :  { %337 = vsyncpa [#allocation3 + $0x1], 1 }
  0x7d   :  { %338 = vsyncpa [#allocation6], 1 }
  0x7e   :  { %340 = vsyncpa [#allocation6 + $0x1], 1 }
  0x7f   :  { %341 = vsyncpa [#allocation4], 1 }
  0x80   :  { %343 = vsyncpa [#allocation4 + $0x1], 1 }
  0x81   :  { %344 = vsyncpa [#allocation9], 1 }
  0x82   :  { %346 = vsyncpa [#allocation9 + $0x1], 1 }

</bundles_post_ra>
